<compile_context>
chip_gen: v6e
topology: v6e:2x2x1
jax: 0.10.0
libtpu: 0.0.40
codegen_flags: <defaults>
</compile_context>

<pallas_src>
import jax
import jax.numpy as jnp
from jax.experimental import pallas as pl
from jax.experimental.pallas import tpu as pltpu

HIDDEN = 64
OUT = 32
PACK = 128 // OUT  # 4 original batch rows packed per lane-dense output row


def _round_up(n, m):
    return ((n + m - 1) // m) * m


def _block_diag4(w):
    """(a, b) -> (4a, 4b) block-diagonal: out[p*a+i, q*b+k] = (p==q) * w[i, k]."""
    a, b = w.shape
    eye = jnp.eye(PACK, dtype=w.dtype)
    return jnp.einsum("pq,ab->paqb", eye, w).reshape(PACK * a, PACK * b)


def encoder_kernel(x_ref, w1_ref, b1_ref, w2_ref, b2_ref, o_ref):
    # x_ref:  (TR, 4*in_dim) -- 4 original rows packed per row
    # w1_ref: (4*in_dim, 256) block-diagonal, b1_ref: (1, 256)
    # w2_ref: (256, 128)      block-diagonal, b2_ref: (1, 128)
    # o_ref:  (TR, 128)       -- lane-dense packed output
    h = jnp.dot(x_ref[...], w1_ref[...], preferred_element_type=jnp.float32)
    h = jnp.maximum(h + b1_ref[...], 0.0)             # bias broadcast + ReLU on VPU
    out = jnp.dot(h, w2_ref[...], preferred_element_type=jnp.float32)
    o_ref[...] = (out + b2_ref[...]).astype(o_ref.dtype)


def adult_encoder_forward(x, w1, b1, w2, b2, *, tile_rows=512):
    """x: (B, in_dim) f32.  w1: (in_dim, 64), b1: (64,), w2: (64, 32), b2: (32,).

    tile_rows is the packed-row tile (each packed row = 4 original rows), so the
    default 512 processes 2048 batch rows per grid step while using only
    ~1.5 MiB of (double-buffered) VMEM for the streamed tiles.
    """
    B, in_dim = x.shape

    # --- batch padding / packing (free row-major reshape) -------------------
    r_needed = pl.cdiv(B, PACK)                       # packed rows required
    tr = min(tile_rows, _round_up(r_needed, 8))       # tile: multiple of 8 sublanes
    r_pad = _round_up(r_needed, tr)
    b_pad = PACK * r_pad
    if b_pad != B:
        x = jnp.pad(x, ((0, b_pad - B), (0, 0)))
    x_packed = x.reshape(r_pad, PACK * in_dim)

    # --- lane-dense (block-diagonal) weights, built once in the wrapper -----
    # (Under jit these fold / are hoisted out of the kernel's hot path.)
    w1_wide = _block_diag4(w1)                        # (4*in_dim, 256)
    w2_wide = _block_diag4(w2)                        # (256, 128)
    b1_t = jnp.tile(b1, PACK)[None, :]                # (1, 256)
    b2_t = jnp.tile(b2, PACK)[None, :]                # (1, 128)

    grid = (r_pad // tr,)
    flops = 2 * b_pad * (in_dim * HIDDEN + HIDDEN * OUT)
    bytes_accessed = 4 * (b_pad * (in_dim + OUT)
                          + w1_wide.size + b1_t.size + w2_wide.size + b2_t.size)

    out_packed = pl.pallas_call(
        encoder_kernel,
        out_shape=jax.ShapeDtypeStruct((r_pad, PACK * OUT), x.dtype),
        grid=grid,
        in_specs=[
            pl.BlockSpec((tr, PACK * in_dim), lambda i: (i, 0)),             # x tile
            pl.BlockSpec((PACK * in_dim, PACK * HIDDEN), lambda i: (0, 0)),  # W1 resident
            pl.BlockSpec((1, PACK * HIDDEN), lambda i: (0, 0)),              # b1 resident
            pl.BlockSpec((PACK * HIDDEN, PACK * OUT), lambda i: (0, 0)),     # W2 resident
            pl.BlockSpec((1, PACK * OUT), lambda i: (0, 0)),                 # b2 resident
        ],
        out_specs=pl.BlockSpec((tr, PACK * OUT), lambda i: (i, 0)),
        compiler_params=pltpu.CompilerParams(
            dimension_semantics=("parallel",),        # megacore sharding
            vmem_limit_bytes=32 * 1024 * 1024,        # explicit; tiles leave ample headroom
        ),
        cost_estimate=pl.CostEstimate(
            flops=flops, transcendentals=0, bytes_accessed=bytes_accessed),
    )(x_packed, w1_wide, b1_t, w2_wide, b2_t)

    # Free row-major un-packing back to (B, 32).
    return out_packed.reshape(b_pad, OUT)[:B]


def init_params(key, in_dim, dtype=jnp.float32):
    """Deterministic synthetic init (PyTorch nn.Linear-style uniform bounds)."""
    k1, k2, k3, k4 = jax.random.split(key, 4)
    bound1 = 1.0 / jnp.sqrt(in_dim)
    bound2 = 1.0 / jnp.sqrt(HIDDEN)
    # Stored already transposed to (in, out) for the kernel.
    w1 = jax.random.uniform(k1, (in_dim, HIDDEN), dtype, -bound1, bound1)
    b1 = jax.random.uniform(k2, (HIDDEN,), dtype, -bound1, bound1)
    w2 = jax.random.uniform(k3, (HIDDEN, OUT), dtype, -bound2, bound2)
    b2 = jax.random.uniform(k4, (OUT,), dtype, -bound2, bound2)
    return w1, b1, w2, b2


if __name__ == "__main__":
    key = jax.random.PRNGKey(0)
    k_x, k_p = jax.random.split(key)

    batch, in_dim = 8, 16
    x = jax.random.normal(k_x, (batch, in_dim), jnp.float32)
    w1, b1, w2, b2 = init_params(k_p, in_dim)

    fwd = jax.jit(adult_encoder_forward)
    out = fwd(x, w1, b1, w2, b2)
    out = jax.block_until_ready(out)

    # Pure-JAX reference check of the same forward pass.
    ref = jnp.maximum(x @ w1 + b1, 0.0) @ w2 + b2
    assert out.shape == (batch, OUT)
    assert jnp.allclose(out, ref, atol=1e-5, rtol=1e-5)

    print("KERNEL_OK")
</pallas_src>

<mosaic_0001>
module attributes {stable_mosaic.version = 11 : i64} {
  func.func @encoder_kernel(%arg0: i32, %arg1: memref<8x64xf32, #tpu.memory_space<vmem>>, %arg2: memref<64x256xf32, #tpu.memory_space<vmem>>, %arg3: memref<1x256xf32, #tpu.memory_space<vmem>>, %arg4: memref<256x128xf32, #tpu.memory_space<vmem>>, %arg5: memref<1x128xf32, #tpu.memory_space<vmem>>, %arg6: memref<8x128xf32, #tpu.memory_space<vmem>>) attributes {dimension_semantics = [#tpu.dimension_semantics<parallel>], iteration_bounds = array<i64: 1>, scalar_prefetch = 0 : i64, scratch_operands = 0 : i64, tpu.core_type = #tpu.core_type<tc>, window_params = [{transform_indices = @transform_0, window_bounds = array<i64: 8, 64>}, {pipeline_mode = #tpu.pipeline_mode<synchronous>, transform_indices = @transform_1, window_bounds = array<i64: 64, 256>}, {pipeline_mode = #tpu.pipeline_mode<synchronous>, transform_indices = @transform_2, window_bounds = array<i64: 1, 256>}, {pipeline_mode = #tpu.pipeline_mode<synchronous>, transform_indices = @transform_3, window_bounds = array<i64: 256, 128>}, {pipeline_mode = #tpu.pipeline_mode<synchronous>, transform_indices = @transform_4, window_bounds = array<i64: 1, 128>}, {transform_indices = @transform_5, window_bounds = array<i64: 8, 128>}]} {
    %c0 = arith.constant 0 : index
    %c0_0 = arith.constant 0 : index
    %0 = vector.load %arg1[%c0, %c0_0] : memref<8x64xf32, #tpu.memory_space<vmem>>, vector<8x64xf32>
    %c0_1 = arith.constant 0 : index
    %c0_2 = arith.constant 0 : index
    %1 = vector.load %arg2[%c0_1, %c0_2] : memref<64x256xf32, #tpu.memory_space<vmem>>, vector<64x256xf32>
    %cst = arith.constant dense<0.000000e+00> : vector<8x256xf32>
    %2 = tpu.matmul %0, %1, %cst {dimension_numbers = #tpu.dot_dimension_numbers<[1], [0], [0], [1], [0, 0, 1, 1], [], []>} : vector<8x64xf32>, vector<64x256xf32>, vector<8x256xf32> -> vector<8x256xf32>
    %c0_3 = arith.constant 0 : index
    %c0_4 = arith.constant 0 : index
    %3 = vector.load %arg3[%c0_3, %c0_4] : memref<1x256xf32, #tpu.memory_space<vmem>>, vector<1x256xf32>
    %4 = vector.broadcast %3 : vector<1x256xf32> to vector<8x256xf32>
    %5 = arith.addf %2, %4 : vector<8x256xf32>
    %cst_5 = arith.constant 0.000000e+00 : f32
    %6 = vector.broadcast %cst_5 : f32 to vector<8x256xf32>
    %7 = arith.maximumf %5, %6 : vector<8x256xf32>
    %c0_6 = arith.constant 0 : index
    %c0_7 = arith.constant 0 : index
    %8 = vector.load %arg4[%c0_6, %c0_7] : memref<256x128xf32, #tpu.memory_space<vmem>>, vector<256x128xf32>
    %cst_8 = arith.constant dense<0.000000e+00> : vector<8x128xf32>
    %9 = tpu.matmul %7, %8, %cst_8 {dimension_numbers = #tpu.dot_dimension_numbers<[1], [0], [0], [1], [0, 0, 1, 1], [], []>} : vector<8x256xf32>, vector<256x128xf32>, vector<8x128xf32> -> vector<8x128xf32>
    %c0_9 = arith.constant 0 : index
    %c0_10 = arith.constant 0 : index
    %10 = vector.load %arg5[%c0_9, %c0_10] : memref<1x128xf32, #tpu.memory_space<vmem>>, vector<1x128xf32>
    %11 = vector.broadcast %10 : vector<1x128xf32> to vector<8x128xf32>
    %12 = arith.addf %9, %11 : vector<8x128xf32>
    %c0_11 = arith.constant 0 : index
    %c0_12 = arith.constant 0 : index
    %13 = vector.load %arg6[%c0_11, %c0_12] : memref<8x128xf32, #tpu.memory_space<vmem>>, vector<8x128xf32>
    tpu.vector_store %arg6[%c0_11, %c0_12], %12 {strides = array<i32>} : memref<8x128xf32, #tpu.memory_space<vmem>>, vector<8x128xf32>,
    return
  }
  func.func @transform_0(%arg0: i32) -> (i32, i32) {
    %c0_i32 = arith.constant 0 : i32
    %c0_i32_0 = arith.constant 0 : i32
    return %arg0, %c0_i32 : i32, i32
  }
  func.func @transform_1(%arg0: i32) -> (i32, i32) {
    %c0_i32 = arith.constant 0 : i32
    %c0_i32_0 = arith.constant 0 : i32
    %c0_i32_1 = arith.constant 0 : i32
    return %c0_i32, %c0_i32_0 : i32, i32
  }
  func.func @transform_2(%arg0: i32) -> (i32, i32) {
    %c0_i32 = arith.constant 0 : i32
    %c0_i32_0 = arith.constant 0 : i32
    %c0_i32_1 = arith.constant 0 : i32
    return %c0_i32, %c0_i32_0 : i32, i32
  }
  func.func @transform_3(%arg0: i32) -> (i32, i32) {
    %c0_i32 = arith.constant 0 : i32
    %c0_i32_0 = arith.constant 0 : i32
    %c0_i32_1 = arith.constant 0 : i32
    return %c0_i32, %c0_i32_0 : i32, i32
  }
  func.func @transform_4(%arg0: i32) -> (i32, i32) {
    %c0_i32 = arith.constant 0 : i32
    %c0_i32_0 = arith.constant 0 : i32
    %c0_i32_1 = arith.constant 0 : i32
    return %c0_i32, %c0_i32_0 : i32, i32
  }
  func.func @transform_5(%arg0: i32) -> (i32, i32) {
    %c0_i32 = arith.constant 0 : i32
    %c0_i32_0 = arith.constant 0 : i32
    return %arg0, %c0_i32 : i32, i32
  }
}

</mosaic_0001>

<bundles_post_ra>
// kernel: tile.13
= control target key start
LH: loop header
LB: loop body
LE: loop exit
PB: predicated region body
PF: predicated region fallthrough
CT: control target
= control target key end

     0   :  { %s22_s0 = inlined_call_operand.vmem [shape: f32[64], index: 0, kind: input, shape index: {}]   ;;  %s23_s1 = inlined_call_operand.vmem [shape: f32[4,64], index: 1, kind: output, shape index: {}]  }
   0x1   :  { %v4_v0 = vld [vmem:[%s22_s0] ss:$0 sm:$0xff] }
   0x2   :  { %5 = vst [vmem:[%s23_s1] sm:$0xf] %v4_v0 }

// kernel: tile.14
= control target key start
LH: loop header
LB: loop body
LE: loop exit
PB: predicated region body
PF: predicated region fallthrough
CT: control target
= control target key end

     0   :  { %s7_s8 = smov 3  ;;  %vm9_vm0 = vcmask 523264   ;;  %s34_s9 = smov 64   ;;  %vm16_vm1 = vcmask 1048064   ;;  %s54_s0 = inlined_call_operand.vmem [shape: f32[4,64], index: 0, kind: input, shape index: {}]   ;;  %s55_s1 = inlined_call_operand.vmem [shape: f32[1,256], index: 1, kind: output, shape index: {}]  }
   0x1   :  { %v5_v0 = vld [vmem:[%s54_s0] sm:$0xf]  ;;  %s12_s0 = smov 3 }
   0x2   :  { %6 = vst [vmem:[#allocation1] sm:$0xf] %v5_v0 }
   0x9   :  { %v13_v1 = vld [vmem:[#allocation1 + $0x1] ss:$2 sm:%s12_s0]   ;;  %v8_v2 = vld [vmem:[#allocation1] ss:$2 sm:%s7_s8]  }
   0xa   :  { %14 = vrot.lane.b32.xlu0 %v13_v1, %s34_s9  ;;  %10 = vst.msk [vmem:[#allocation0] ss:$8 sm:$0x3] %vm9_vm0, %v8_v2  }
  0x7c   :  { %v15_v3 = vpop.permute.xlu0 %14  }
  0x7d   :  { %17 = vst.msk [vmem:[#allocation0] ss:$8 sm:$0x3] %vm16_vm1, %v15_v3  }
  0x84   :  { %v22_v4 = vld [vmem:[#allocation0] sm:$0x1]  ;;  %v27_v5 = vld [vmem:[#allocation0 + $0x8] sm:$0x1] }
  0x85   :  { %25 = vst [vmem:[%s55_s1] sm:$0x1] %v22_v4  ;;  %32 = vst [vmem:[%s55_s1 + $0x1] sm:$0x1] %v27_v5 }

// kernel: tile.18
= control target key start
LH: loop header
LB: loop body
LE: loop exit
PB: predicated region body
PF: predicated region fallthrough
CT: control target
= control target key end

     0   :  { %s22_s0 = inlined_call_operand.vmem [shape: f32[32], index: 0, kind: input, shape index: {}]   ;;  %s23_s1 = inlined_call_operand.vmem [shape: f32[4,32], index: 1, kind: output, shape index: {}]  }
   0x1   :  { %v4_v0 = vld [vmem:[%s22_s0] ss:$0 sm:$0xff] }
   0x2   :  { %5 = vst [vmem:[%s23_s1] sm:$0xf] %v4_v0 }

// kernel: tile.19
= control target key start
LH: loop header
LB: loop body
LE: loop exit
PB: predicated region body
PF: predicated region fallthrough
CT: control target
= control target key end

     0   :  { %vm8_vm0 = vcmask 261120   ;;  %s40_s8 = smov 32   ;;  %s41_s9 = smov 64   ;;  %vm14_vm1 = vcmask 1048320   ;;  %vm20_vm2 = vcmask 785920   ;;  %vm26_vm3 = vcmask 523520   ;;  %s58_s0 = inlined_call_operand.vmem [shape: f32[4,32], index: 0, kind: input, shape index: {}]   ;;  %s59_s1 = inlined_call_operand.vmem [shape: f32[1,128], index: 1, kind: output, shape index: {}]  }
   0x1   :  { %v5_v0 = vld [vmem:[%s58_s0] sm:$0xf]  ;;  %s39_s0 = smov 96  }
   0x2   :  { %6 = vst [vmem:[#allocation1] sm:$0xf] %v5_v0 }
   0x9   :  { %v11_v1 = vld [vmem:[#allocation1 + $0x3] sm:$0x1]   ;;  %v23_v2 = vld [vmem:[#allocation1 + $0x1] sm:$0x1]   ;;  %v7_v3 = vld [vmem:[#allocation1] sm:$0x1]  }
   0xa   :  { %12 = vrot.lane.b32.xlu0 %v11_v1, %s39_s0  ;;  %24 = vrot.lane.b32.xlu1 %v23_v2, %s40_s8  ;;  %v17_v4 = vld [vmem:[#allocation1 + $0x2] sm:$0x1]   ;;  %9 = vst.msk [vmem:[#allocation0] sm:$0x1] %vm8_vm0, %v7_v3  }
   0xe   :  { %18 = vrot.lane.b32.xlu0 %v17_v4, %s41_s9 }
  0x7c   :  { %v13_v5 = vpop.permute.xlu0 %12   ;;  %v25_v6 = vpop.permute.xlu1 %24  }
  0x7d   :  { %15 = vst.msk [vmem:[#allocation0] sm:$0x1] %vm14_vm1, %v13_v5  }
  0x80   :  { %v19_v7 = vpop.permute.xlu0 %18  }
  0x81   :  { %21 = vst.msk [vmem:[#allocation0] sm:$0x1] %vm20_vm2, %v19_v7  }
  0x82   :  { %27 = vst.msk [vmem:[#allocation0] sm:$0x1] %vm26_vm3, %v25_v6  }
  0x89   :  { %v32_v8 = vld [vmem:[#allocation0] sm:$0x1] }
  0x8a   :  { %35 = vst [vmem:[%s59_s1] sm:$0x1] %v32_v8 }

// kernel: adult_encoder_forward.1
= control target key start
LH: loop header
LB: loop body
LE: loop exit
PB: predicated region body
PF: predicated region fallthrough
CT: control target
= control target key end

     0   :  { %v278_v3 = vmov 0.0   ;;  %vm49_vm0 = vcmask 523264   ;;  %v39_v50 = vlaneseq  ;;  %s465_s1 = inlined_call_operand.vmem [shape: f32[64,256], index: 1, kind: input, shape index: {}]   ;;  %s466_s3 = inlined_call_operand.vmem [shape: f32[256,128], index: 3, kind: input, shape index: {}]   ;;  %s467_s0 = inlined_call_operand.vmem [shape: f32[8,64], index: 0, kind: input, shape index: {}]   ;;  %s468_s2 = inlined_call_operand.vmem [shape: f32[1,256], index: 2, kind: input, shape index: {}]   ;;  %s469_s4 = inlined_call_operand.vmem [shape: f32[1,128], index: 4, kind: input, shape index: {}]   ;;  %s470_s5 = inlined_call_operand.vmem [shape: f32[8,128], index: 5, kind: output, shape index: {}]  }
   0x1   :  { %v36_v0 = vld [vmem:[%s465_s1 + $0x78] sm:$0xff]  ;;  %v35_v1 = vld [vmem:[%s465_s1 + $0x70] sm:$0xff]  ;;  %v34_v2 = vld [vmem:[%s465_s1 + $0x68] sm:$0xff]  ;;  %117 = vmatprep.mubr.f32.mxu0 %v278_v3 }
   0x2   :  { %69 = vmatprep.subr.mxu0 %v36_v0  ;;  %v33_v4 = vld [vmem:[%s465_s1 + $0x60] sm:$0xff]  ;;  %v32_v5 = vld [vmem:[%s465_s1 + $0x58] sm:$0xff]  ;;  %v31_v6 = vld [vmem:[%s465_s1 + $0x50] sm:$0xff]  ;;  %v40_v51 = vshrl.u32 %v39_v50, 7 }
   0x3   :  { %70 = vmatpush1.msra.mxu0 %v35_v1  ;;  %v30_v7 = vld [vmem:[%s465_s1 + $0x48] sm:$0xff]  ;;  %v29_v8 = vld [vmem:[%s465_s1 + $0x40] sm:$0xff]  ;;  %v28_v9 = vld [vmem:[%s465_s1 + $0x38] sm:$0xff] }
   0x4   :  { %71 = vmatprep.subr.mxu0 %v34_v2  ;;  %v157_v10 = vld [vmem:[%s466_s3 + $0xf8] sm:$0xff]  ;;  %v156_v12 = vld [vmem:[%s466_s3 + $0xf0] sm:$0xff]  ;;  %v155_v15 = vld [vmem:[%s466_s3 + $0xe8] sm:$0xff]  ;;  %v41_v52 = vsub.s32 0, %v40_v51  ;;  %v45_v54 = vsub.s32 1, %v40_v51 }
   0x5   :  { %72 = vmatpush1.msra.mxu0 %v33_v4  ;;  %242 = vmatprep.subr.mxu1 %v157_v10  ;;  %v141_v11 = vld [vmem:[%s466_s3 + $0x78] sm:$0xff]  ;;  %v140_v13 = vld [vmem:[%s466_s3 + $0x70] sm:$0xff]  ;;  %v26_v16 = vld [vmem:[%s465_s1 + $0x28] sm:$0xff] }
   0x6   :  { %73 = vmatprep.subr.mxu0 %v32_v5  ;;  %v27_v14 = vld [vmem:[%s465_s1 + $0x30] sm:$0xff]  ;;  %243 = vmatpush3.msra.mxu1 %v141_v11  ;;  %v139_v17 = vld [vmem:[%s466_s3 + $0x68] sm:$0xff]  ;;  %v25_v18 = vld [vmem:[%s465_s1 + $0x20] sm:$0xff] }
   0x7   :  { %74 = vmatpush1.msra.mxu0 %v31_v6  ;;  %244 = vmatprep.subr.mxu1 %v156_v12  ;;  %v154_v19 = vld [vmem:[%s466_s3 + $0xe0] sm:$0xff]  ;;  %v24_v20 = vld [vmem:[%s465_s1 + $0x18] sm:$0xff]  ;;  %v23_v22 = vld [vmem:[%s465_s1 + $0x10] sm:$0xff] }
   0x8   :  { %75 = vmatprep.subr.mxu0 %v30_v7  ;;  %245 = vmatpush3.msra.mxu1 %v140_v13  ;;  %v138_v21 = vld [vmem:[%s466_s3 + $0x60] sm:$0xff]  ;;  %v153_v23 = vld [vmem:[%s466_s3 + $0xd8] sm:$0xff]  ;;  %v22_v24 = vld [vmem:[%s465_s1 + $0x8] sm:$0xff] }
   0x9   :  { %76 = vmatpush1.msra.mxu0 %v29_v8  ;;  %246 = vmatprep.subr.mxu1 %v155_v15  ;;  %v137_v25 = vld [vmem:[%s466_s3 + $0x58] sm:$0xff]  ;;  %v21_v26 = vld [vmem:[%s465_s1] sm:$0xff]  ;;  %v152_v27 = vld [vmem:[%s466_s3 + $0xd0] sm:$0xff] }
   0xa   :  { %77 = vmatprep.subr.mxu0 %v28_v9  ;;  %247 = vmatpush3.msra.mxu1 %v139_v17  ;;  %v20_v28 = vld [vmem:[%s467_s0] sm:$0xff]  ;;  %v136_v29 = vld [vmem:[%s466_s3 + $0x50] sm:$0xff]  ;;  %v151_v30 = vld [vmem:[%s466_s3 + $0xc8] sm:$0xff] }
   0xb   :  { %78 = vmatpush1.msra.mxu0 %v27_v14  ;;  %248 = vmatprep.subr.mxu1 %v154_v19  ;;  %v135_v31 = vld [vmem:[%s466_s3 + $0x48] sm:$0xff]  ;;  %v150_v32 = vld [vmem:[%s466_s3 + $0xc0] sm:$0xff]  ;;  %v149_v34 = vld [vmem:[%s466_s3 + $0xb8] sm:$0xff] }
   0xc   :  { %79 = vmatprep.subr.mxu0 %v26_v16  ;;  %249 = vmatpush3.msra.mxu1 %v138_v21  ;;  %v134_v33 = vld [vmem:[%s466_s3 + $0x40] sm:$0xff]  ;;  %v133_v35 = vld [vmem:[%s466_s3 + $0x38] sm:$0xff]  ;;  %v148_v36 = vld [vmem:[%s466_s3 + $0xb0] sm:$0xff] }
   0xd   :  { %80 = vmatpush1.msra.mxu0 %v25_v18  ;;  %250 = vmatprep.subr.mxu1 %v153_v23  ;;  %v132_v37 = vld [vmem:[%s466_s3 + $0x30] sm:$0xff]  ;;  %v147_v38 = vld [vmem:[%s466_s3 + $0xa8] sm:$0xff]  ;;  %v146_v40 = vld [vmem:[%s466_s3 + $0xa0] sm:$0xff] }
   0xe   :  { %81 = vmatprep.subr.mxu0 %v24_v20  ;;  %251 = vmatpush3.msra.mxu1 %v137_v25  ;;  %v131_v39 = vld [vmem:[%s466_s3 + $0x28] sm:$0xff]  ;;  %v130_v41 = vld [vmem:[%s466_s3 + $0x20] sm:$0xff]  ;;  %v145_v42 = vld [vmem:[%s466_s3 + $0x98] sm:$0xff] }
   0xf   :  { %82 = vmatpush1.msra.mxu0 %v23_v22  ;;  %252 = vmatprep.subr.mxu1 %v152_v27  ;;  %v129_v43 = vld [vmem:[%s466_s3 + $0x18] sm:$0xff]  ;;  %v144_v44 = vld [vmem:[%s466_s3 + $0x90] sm:$0xff]  ;;  %v143_v46 = vld [vmem:[%s466_s3 + $0x88] sm:$0xff] }
  0x10   :  { %83 = vmatprep.subr.mxu0 %v22_v24  ;;  %253 = vmatpush3.msra.mxu1 %v136_v29  ;;  %v128_v45 = vld [vmem:[%s466_s3 + $0x10] sm:$0xff]  ;;  %v127_v47 = vld [vmem:[%s466_s3 + $0x8] sm:$0xff]  ;;  %v142_v48 = vld [vmem:[%s466_s3 + $0x80] sm:$0xff] }
  0x11   :  { %84 = vmatpush1.msra.mxu0 %v21_v26  ;;  %254 = vmatprep.subr.mxu1 %v151_v30  ;;  %v126_v49 = vld [vmem:[%s466_s3] sm:$0xff] }
  0x12   :  { %240 = vmatmul.mubr.msk.f32.vlgmr.msra.gmra.mxu0 %vm49_vm0, %v20_v28  ;;  %255 = vmatpush3.msra.mxu1 %v135_v31  ;;  %v37_v53 = vld [vmem:[%s468_s2] sm:$0x3] }
  0x13   :  { %256 = vmatprep.subr.mxu1 %v150_v32  ;;  %v42_v55 = vrot.slane %v37_v53, %v41_v52  ;;  %v46_v56 = vrot.slane %v37_v53, %v45_v54  ;;  %v241_v0 = vld [vmem:[%s469_s4] ss:$0 sm:$0xff] }
  0x14   :  { %257 = vmatpush3.msra.mxu1 %v134_v33 }
  0x15   :  { %258 = vmatprep.subr.mxu1 %v149_v34 }
  0x16   :  { %259 = vmatpush3.msra.mxu1 %v133_v35 }
  0x17   :  { %260 = vmatprep.subr.mxu1 %v148_v36 }
  0x18   :  { %261 = vmatpush3.msra.mxu1 %v132_v37 }
  0x19   :  { %262 = vmatprep.subr.mxu1 %v147_v38 }
  0x1a   :  { %263 = vmatpush3.msra.mxu1 %v131_v39 }
  0x1b   :  { %264 = vmatprep.subr.mxu1 %v146_v40 }
  0x1c   :  { %265 = vmatpush3.msra.mxu1 %v130_v41 }
  0x1d   :  { %266 = vmatprep.subr.mxu1 %v145_v42 }
  0x1e   :  { %267 = vmatpush3.msra.mxu1 %v129_v43 }
  0x1f   :  { %268 = vmatprep.subr.mxu1 %v144_v44 }
  0x20   :  { %269 = vmatpush3.msra.mxu1 %v128_v45 }
  0x21   :  { %270 = vmatprep.subr.mxu1 %v143_v46 }
  0x22   :  { %271 = vmatpush3.msra.mxu1 %v127_v47 }
  0x23   :  { %272 = vmatprep.subr.mxu1 %v142_v48 }
  0x24   :  { %273 = vmatpush3.msra.mxu1 %v126_v49 }
  0xd2   :  { %v119_v57 = vpop.f32.mrf.mxu0 }
  0xd3   :  { %v120_v58 = vadd.f32 %v119_v57, %v42_v55 }
  0xd4   :  { %v121_v59 = vpop.f32.mrf.mxu0 }
  0xd5   :  { %v122_v60 = vadd.f32 %v121_v59, %v46_v56  ;;  %v124_v62 = vmax.f32 %v120_v58, 0.0 }
  0xd7   :  { %v125_v61 = vmax.f32 %v122_v60, 0.0 }
  0xd9   :  { %229 = vmatprep.mubr.f32.mxu1 %v125_v61 }
  0xda   :  { %230 = vmatmul.mubr.f32.vlgmr.msra.gmra.mxu1 %v124_v62 }
 0x19a   :  { %v274_v63 = vpop.f32.mrf.mxu1 }
 0x19c   :  { %v275_v1 = vpop.f32.mrf.mxu1 }
 0x19d   :  { %v276_v2 = vadd.f32 %v275_v1, %v274_v63 }
 0x19f   :  { %v232_v3 = vadd.f32 %v276_v2, %v241_v0 }
 0x1a1   :  { %235 = vst [vmem:[%s470_s5] sm:$0xff] %v232_v3 }

</bundles_post_ra>
